<compile_context>
chip_gen: v7x
topology: tpu7x:2x2x1
jax: 0.10.0
libtpu: 0.0.40
codegen_flags: <defaults>
</compile_context>

<pallas_src>
import jax
import jax.numpy as jnp
from jax.experimental import pallas as pl
from jax.experimental.pallas import tpu as pltpu

# ---- small synthetic shapes consistent with the module config ----
BATCH = 2          # kvcache_config.max_batch_size
SEQ = 8            # kvcache_config.max_seq_len
HIDDEN = 32        # hstu_config.hidden_size == embedding dim
NUM_LAYERS = 2     # hstu_config.num_layers
VOCAB = 64         # embedding table rows
HEAD_ARCH = [64, 32, 8]      # task_config.prediction_head_arch[0]; logit dim = 8
NUM_CANDIDATES = SEQ // 2    # default_num_candidates in get_jagged_metadata_buffer
LOGIT_PAD = 128              # lane-dense kernel output width (real logits = 8)


# ----------------------------------------------------------------------------
# Fused Pallas kernel (one grid step == one batch sequence):
#   embedding gather + stacked HSTU layers + MLP prediction head
# ----------------------------------------------------------------------------
def fused_ranking_kernel(ids_ref, emb_ref,
                         wuvqk_ref, buvqk_ref, wo_ref, bo_ref,
                         w1_ref, b1_ref, w2_ref, b2_ref, w3_ref, b3_ref,
                         o_ref):
    S, D = SEQ, HIDDEN
    bf16 = jnp.bfloat16

    # ---- embedding "gather" fused as a one-hot matmul on the MXU (exact) ----
    ids = ids_ref[...]                                          # [S, 1] int32
    vcol = jax.lax.broadcasted_iota(jnp.int32, (S, VOCAB), 1)
    onehot = (vcol == ids).astype(bf16)                         # [S, VOCAB]
    h = jnp.dot(onehot, emb_ref[...],
                preferred_element_type=jnp.float32)             # [S, D] f32

    # ---- causal mask folded with the 1/S scale, built ONCE, reused per layer
    row_i = jax.lax.broadcasted_iota(jnp.int32, (S, S), 0)
    col_i = jax.lax.broadcasted_iota(jnp.int32, (S, S), 1)
    mask_scaled = jnp.where(col_i <= row_i, 1.0 / S, 0.0)       # [S, S] f32

    def layernorm(x):
        # one-pass variance: E[x^2] - mean^2 (two back-to-back XLU reduces)
        mu = jnp.mean(x, axis=-1, keepdims=True)
        msq = jnp.mean(x * x, axis=-1, keepdims=True)
        return (x - mu) * jax.lax.rsqrt(msq - mu * mu + 1e-6)

    # ---- HSTU transduction layers (statically unrolled; weights stacked
    #      [L, ...] and fully VMEM-resident) ----
    for l in range(NUM_LAYERS):
        hn = layernorm(h)

        # fused U|V|Q|K projection: ONE 128-lane-wide MXU push + ONE bias/SiLU
        # pass on the fused slab, then split.
        y = jnp.dot(hn.astype(bf16), wuvqk_ref[l],
                    preferred_element_type=jnp.float32) + buvqk_ref[l]
        y = y * jax.nn.sigmoid(y)                               # SiLU, f32
        u = y[:, 0 * D:1 * D]
        v = y[:, 1 * D:2 * D]
        q = y[:, 2 * D:3 * D]
        k = y[:, 3 * D:4 * D]

        # HSTU pointwise-SiLU causal attention (no softmax); single [S,S] dot.
        s = jax.lax.dot_general(
            q.astype(bf16), k.astype(bf16),
            (((1,), (1,)), ((), ())),                           # q . k^T
            preferred_element_type=jnp.float32)                 # [S, S]
        s = (s * jax.nn.sigmoid(s)) * mask_scaled               # silu + mask + 1/S
        att = jnp.dot(s.astype(bf16), v.astype(bf16),
                      preferred_element_type=jnp.float32)       # [S, D]

        # output layernorm, gate by U, output projection, residual
        gated = layernorm(att) * u
        h = h + jnp.dot(gated.astype(bf16), wo_ref[l],
                        preferred_element_type=jnp.float32) + bo_ref[l]

    # ---- dense prediction head (MLP, ReLU), lane-dense padded output.
    #      Run on all S rows (row-wise MLP); candidate rows are selected in
    #      the wrapper (pure layout plumbing, keeps 8-sublane-aligned stores).
    z = jnp.dot(h.astype(bf16), w1_ref[...],
                preferred_element_type=jnp.float32) + b1_ref[...]
    z = jnp.maximum(z, 0.0)
    z = jnp.dot(z.astype(bf16), w2_ref[...],
                preferred_element_type=jnp.float32) + b2_ref[...]
    z = jnp.maximum(z, 0.0)
    logits = jnp.dot(z.astype(bf16), w3_ref[...],
                     preferred_element_type=jnp.float32) + b3_ref[...]
    o_ref[...] = logits                                         # [S, LOGIT_PAD]


# ----------------------------------------------------------------------------
# Wrapper
# ----------------------------------------------------------------------------
def ranking_gr_fused(token_ids, params):
    m = params["mlp"]
    vmem = pl.BlockSpec(memory_space=pltpu.MemorySpace.VMEM)   # whole-array VMEM

    ids_col = token_ids.reshape(BATCH * SEQ, 1)                # [B*S, 1] int32

    out = pl.pallas_call(
        fused_ranking_kernel,
        out_shape=jax.ShapeDtypeStruct((BATCH * SEQ, LOGIT_PAD), jnp.float32),
        grid=(BATCH,),
        in_specs=[
            pl.BlockSpec((SEQ, 1), lambda b: (b, 0)),          # token ids / batch
            vmem,                                              # embedding table
            vmem, vmem, vmem, vmem,                            # stacked HSTU weights
            vmem, vmem, vmem, vmem, vmem, vmem,                # MLP head
        ],
        out_specs=pl.BlockSpec((SEQ, LOGIT_PAD), lambda b: (b, 0)),
        compiler_params=pltpu.CompilerParams(
            dimension_semantics=("parallel",)),                # v7x: 2 TCs
    )(ids_col, params["embedding_table"],
      params["w_uvqk"], params["b_uvqk"], params["w_o"], params["b_o"],
      m["w1"], m["b1"], m["w2"], m["b2"], m["w3p"], m["b3p"])

    # postprocessor: last NUM_CANDIDATES tokens per sequence; strip lane pad.
    hb = out.reshape(BATCH, SEQ, LOGIT_PAD)
    return hb[:, SEQ - NUM_CANDIDATES:, :HEAD_ARCH[-1]].reshape(
        BATCH * NUM_CANDIDATES, HEAD_ARCH[-1])


# ----------------------------------------------------------------------------
# Parameter construction (deterministic, synthetic)
# ----------------------------------------------------------------------------
def init_params(key):
    keys = jax.random.split(key, 8)
    H1, H2, H3 = HEAD_ARCH
    bf16 = jnp.bfloat16

    w3 = jax.random.normal(keys[7], (H2, H3), jnp.float32) * 0.02
    w3p = jnp.zeros((H2, LOGIT_PAD), jnp.float32).at[:, :H3].set(w3)

    # matmul weights stored bf16 (MXU-native on v6e/v7x, half the VMEM);
    # biases stay f32 (added after the f32 accumulation).
    p = {
        "embedding_table": (jax.random.normal(
            keys[0], (VOCAB, HIDDEN), jnp.float32) * 0.02).astype(bf16),
        # fused U|V|Q|K weight: [L, D, 4D] (lane-dense 128-wide output)
        "w_uvqk": (jax.random.normal(
            keys[1], (NUM_LAYERS, HIDDEN, 4 * HIDDEN), jnp.float32) * 0.02
                   ).astype(bf16),
        "b_uvqk": jnp.zeros((NUM_LAYERS, 1, 4 * HIDDEN), jnp.float32),
        "w_o": (jax.random.normal(
            keys[2], (NUM_LAYERS, HIDDEN, HIDDEN), jnp.float32) * 0.02
                ).astype(bf16),
        "b_o": jnp.zeros((NUM_LAYERS, 1, HIDDEN), jnp.float32),
        "mlp": dict(
            w1=(jax.random.normal(keys[5], (HIDDEN, H1), jnp.float32) * 0.02
                ).astype(bf16),
            b1=jnp.zeros((1, H1), jnp.float32),
            w2=(jax.random.normal(keys[6], (H1, H2), jnp.float32) * 0.02
                ).astype(bf16),
            b2=jnp.zeros((1, H2), jnp.float32),
            w3p=w3p.astype(bf16),
            b3p=jnp.zeros((1, LOGIT_PAD), jnp.float32),
        ),
    }
    return p


# ----------------------------------------------------------------------------
# Forward (mirrors InferenceRankingGR.forward hot path)
# ----------------------------------------------------------------------------
@jax.jit
def ranking_gr_forward(token_ids, params):
    # embedding lookup + HSTU block predict + postprocessor (candidate select)
    # + MLP prediction head, all fused into one pallas_call.
    return ranking_gr_fused(token_ids, params)


if __name__ == "__main__":
    key = jax.random.PRNGKey(0)
    k_ids, k_params = jax.random.split(key)
    token_ids = jax.random.randint(k_ids, (BATCH, SEQ), 0, VOCAB,
                                   dtype=jnp.int32)
    params = init_params(k_params)

    logits = ranking_gr_forward(token_ids, params)
    jax.block_until_ready(logits)
    assert logits.shape == (BATCH * NUM_CANDIDATES, HEAD_ARCH[-1])
    assert bool(jnp.all(jnp.isfinite(logits)))
    print("KERNEL_OK")
</pallas_src>

<mosaic_0001>
module attributes {stable_mosaic.version = 11 : i64} {
  func.func @fused_ranking_kernel(%arg0: i32, %arg1: memref<8x1xi32, #tpu.memory_space<vmem>>, %arg2: memref<64x32xbf16, #tpu.memory_space<vmem>>, %arg3: memref<2x32x128xbf16, #tpu.memory_space<vmem>>, %arg4: memref<2x1x128xf32, #tpu.memory_space<vmem>>, %arg5: memref<2x32x32xbf16, #tpu.memory_space<vmem>>, %arg6: memref<2x1x32xf32, #tpu.memory_space<vmem>>, %arg7: memref<32x64xbf16, #tpu.memory_space<vmem>>, %arg8: memref<1x64xf32, #tpu.memory_space<vmem>>, %arg9: memref<64x32xbf16, #tpu.memory_space<vmem>>, %arg10: memref<1x32xf32, #tpu.memory_space<vmem>>, %arg11: memref<32x128xbf16, #tpu.memory_space<vmem>>, %arg12: memref<1x128xf32, #tpu.memory_space<vmem>>, %arg13: memref<8x128xf32, #tpu.memory_space<vmem>>) attributes {dimension_semantics = [#tpu.dimension_semantics<parallel>], iteration_bounds = array<i64: 2>, scalar_prefetch = 0 : i64, scratch_operands = 0 : i64, tpu.core_type = #tpu.core_type<tc>, window_params = [{transform_indices = @transform_0, window_bounds = array<i64: 8, 1>}, {pipeline_mode = #tpu.pipeline_mode<synchronous>, transform_indices = @transform_1, window_bounds = array<i64: 64, 32>}, {pipeline_mode = #tpu.pipeline_mode<synchronous>, transform_indices = @transform_2, window_bounds = array<i64: 2, 32, 128>}, {pipeline_mode = #tpu.pipeline_mode<synchronous>, transform_indices = @transform_3, window_bounds = array<i64: 2, 1, 128>}, {pipeline_mode = #tpu.pipeline_mode<synchronous>, transform_indices = @transform_4, window_bounds = array<i64: 2, 32, 32>}, {pipeline_mode = #tpu.pipeline_mode<synchronous>, transform_indices = @transform_5, window_bounds = array<i64: 2, 1, 32>}, {pipeline_mode = #tpu.pipeline_mode<synchronous>, transform_indices = @transform_6, window_bounds = array<i64: 32, 64>}, {pipeline_mode = #tpu.pipeline_mode<synchronous>, transform_indices = @transform_7, window_bounds = array<i64: 1, 64>}, {pipeline_mode = #tpu.pipeline_mode<synchronous>, transform_indices = @transform_8, window_bounds = array<i64: 64, 32>}, {pipeline_mode = #tpu.pipeline_mode<synchronous>, transform_indices = @transform_9, window_bounds = array<i64: 1, 32>}, {pipeline_mode = #tpu.pipeline_mode<synchronous>, transform_indices = @transform_10, window_bounds = array<i64: 32, 128>}, {pipeline_mode = #tpu.pipeline_mode<synchronous>, transform_indices = @transform_11, window_bounds = array<i64: 1, 128>}, {transform_indices = @transform_12, window_bounds = array<i64: 8, 128>}]} {
    %c0 = arith.constant 0 : index
    %c0_0 = arith.constant 0 : index
    %0 = vector.load %arg1[%c0, %c0_0] : memref<8x1xi32, #tpu.memory_space<vmem>>, vector<8x1xi32>
    %1 = tpu.iota {dimensions = array<i32: 1>} : vector<8x64xi32>
    %2 = vector.broadcast %0 : vector<8x1xi32> to vector<8x64xi32>
    %3 = arith.cmpi eq, %1, %2 : vector<8x64xi32>
    %4 = arith.extui %3 : vector<8x64xi1> to vector<8x64xi32>
    %5 = arith.sitofp %4 : vector<8x64xi32> to vector<8x64xf32>
    %6 = arith.truncf %5 : vector<8x64xf32> to vector<8x64xbf16>
    %c0_1 = arith.constant 0 : index
    %c0_2 = arith.constant 0 : index
    %7 = vector.load %arg2[%c0_1, %c0_2] : memref<64x32xbf16, #tpu.memory_space<vmem>>, vector<64x32xbf16>
    %cst = arith.constant dense<0.000000e+00> : vector<8x32xf32>
    %8 = tpu.matmul %6, %7, %cst {dimension_numbers = #tpu.dot_dimension_numbers<[1], [0], [0], [1], [0, 0, 1, 1], [], []>} : vector<8x64xbf16>, vector<64x32xbf16>, vector<8x32xf32> -> vector<8x32xf32>
    %9 = tpu.iota {dimensions = array<i32: 0>} : vector<8x8xi32>
    %10 = tpu.iota {dimensions = array<i32: 1>} : vector<8x8xi32>
    %11 = arith.cmpi sle, %10, %9 : vector<8x8xi32>
    %cst_3 = arith.constant 1.250000e-01 : f32
    %cst_4 = arith.constant 0.000000e+00 : f32
    %12 = vector.broadcast %cst_3 : f32 to vector<8x8xf32>
    %13 = vector.broadcast %cst_4 : f32 to vector<8x8xf32>
    %14 = arith.select %11, %12, %13 : vector<8x8xi1>, vector<8x8xf32>
    %cst_5 = arith.constant dense<0.000000e+00> : vector<8xf32>
    %15 = vector.multi_reduction <add>, %8, %cst_5 [1] : vector<8x32xf32> to vector<8xf32>
    %16 = vector.shape_cast %15 : vector<8xf32> to vector<8x1xf32>
    %cst_6 = arith.constant 3.200000e+01 : f32
    %17 = vector.broadcast %cst_6 : f32 to vector<8x1xf32>
    %18 = arith.divf %16, %17 : vector<8x1xf32>
    %19 = arith.mulf %8, %8 : vector<8x32xf32>
    %cst_7 = arith.constant dense<0.000000e+00> : vector<8xf32>
    %20 = vector.multi_reduction <add>, %19, %cst_7 [1] : vector<8x32xf32> to vector<8xf32>
    %21 = vector.shape_cast %20 : vector<8xf32> to vector<8x1xf32>
    %cst_8 = arith.constant 3.200000e+01 : f32
    %22 = vector.broadcast %cst_8 : f32 to vector<8x1xf32>
    %23 = arith.divf %21, %22 : vector<8x1xf32>
    %24 = vector.broadcast %18 : vector<8x1xf32> to vector<8x32xf32>
    %25 = arith.subf %8, %24 : vector<8x32xf32>
    %26 = arith.mulf %18, %18 : vector<8x1xf32>
    %27 = arith.subf %23, %26 : vector<8x1xf32>
    %cst_9 = arith.constant 9.99999997E-7 : f32
    %28 = vector.broadcast %cst_9 : f32 to vector<8x1xf32>
    %29 = arith.addf %27, %28 : vector<8x1xf32>
    %30 = math.rsqrt %29 : vector<8x1xf32>
    %31 = vector.broadcast %30 : vector<8x1xf32> to vector<8x32xf32>
    %32 = arith.mulf %25, %31 : vector<8x32xf32>
    %33 = arith.truncf %32 : vector<8x32xf32> to vector<8x32xbf16>
    %c0_10 = arith.constant 0 : index
    %c0_11 = arith.constant 0 : index
    %c0_12 = arith.constant 0 : index
    %34 = vector.load %arg3[%c0_10, %c0_11, %c0_12] : memref<2x32x128xbf16, #tpu.memory_space<vmem>>, vector<1x32x128xbf16>
    %35 = vector.shape_cast %34 : vector<1x32x128xbf16> to vector<32x128xbf16>
    %cst_13 = arith.constant dense<0.000000e+00> : vector<8x128xf32>
    %36 = tpu.matmul %33, %35, %cst_13 {dimension_numbers = #tpu.dot_dimension_numbers<[1], [0], [0], [1], [0, 0, 1, 1], [], []>} : vector<8x32xbf16>, vector<32x128xbf16>, vector<8x128xf32> -> vector<8x128xf32>
    %c0_14 = arith.constant 0 : index
    %c0_15 = arith.constant 0 : index
    %c0_16 = arith.constant 0 : index
    %37 = vector.load %arg4[%c0_14, %c0_15, %c0_16] : memref<2x1x128xf32, #tpu.memory_space<vmem>>, vector<1x1x128xf32>
    %38 = vector.shape_cast %37 : vector<1x1x128xf32> to vector<1x128xf32>
    %39 = vector.broadcast %38 : vector<1x128xf32> to vector<8x128xf32>
    %40 = arith.addf %36, %39 : vector<8x128xf32>
    %41 = arith.negf %40 : vector<8x128xf32>
    %42 = math.exp %41 : vector<8x128xf32>
    %cst_17 = arith.constant 1.000000e+00 : f32
    %43 = vector.broadcast %cst_17 : f32 to vector<8x128xf32>
    %44 = arith.addf %43, %42 : vector<8x128xf32>
    %45 = arith.divf %43, %44 : vector<8x128xf32>
    %46 = arith.mulf %40, %45 : vector<8x128xf32>
    %47 = vector.extract_strided_slice %46 {offsets = [0, 0], sizes = [8, 32], strides = [1, 1]} : vector<8x128xf32> to vector<8x32xf32>
    %48 = vector.extract_strided_slice %46 {offsets = [0, 32], sizes = [8, 32], strides = [1, 1]} : vector<8x128xf32> to vector<8x32xf32>
    %49 = vector.extract_strided_slice %46 {offsets = [0, 64], sizes = [8, 32], strides = [1, 1]} : vector<8x128xf32> to vector<8x32xf32>
    %50 = vector.extract_strided_slice %46 {offsets = [0, 96], sizes = [8, 32], strides = [1, 1]} : vector<8x128xf32> to vector<8x32xf32>
    %51 = arith.truncf %49 : vector<8x32xf32> to vector<8x32xbf16>
    %52 = arith.truncf %50 : vector<8x32xf32> to vector<8x32xbf16>
    %cst_18 = arith.constant dense<0.000000e+00> : vector<8x8xf32>
    %53 = tpu.matmul %51, %52, %cst_18 {dimension_numbers = #tpu.dot_dimension_numbers<[1], [1], [0], [0], [0, 0, 1, 0], [], []>} : vector<8x32xbf16>, vector<8x32xbf16>, vector<8x8xf32> -> vector<8x8xf32>
    %54 = arith.negf %53 : vector<8x8xf32>
    %55 = math.exp %54 : vector<8x8xf32>
    %cst_19 = arith.constant 1.000000e+00 : f32
    %56 = vector.broadcast %cst_19 : f32 to vector<8x8xf32>
    %57 = arith.addf %56, %55 : vector<8x8xf32>
    %58 = arith.divf %56, %57 : vector<8x8xf32>
    %59 = arith.mulf %53, %58 : vector<8x8xf32>
    %60 = arith.mulf %59, %14 : vector<8x8xf32>
    %61 = arith.truncf %60 : vector<8x8xf32> to vector<8x8xbf16>
    %62 = arith.truncf %48 : vector<8x32xf32> to vector<8x32xbf16>
    %cst_20 = arith.constant dense<0.000000e+00> : vector<8x32xf32>
    %63 = tpu.matmul %61, %62, %cst_20 {dimension_numbers = #tpu.dot_dimension_numbers<[1], [0], [0], [1], [0, 0, 1, 1], [], []>} : vector<8x8xbf16>, vector<8x32xbf16>, vector<8x32xf32> -> vector<8x32xf32>
    %cst_21 = arith.constant dense<0.000000e+00> : vector<8xf32>
    %64 = vector.multi_reduction <add>, %63, %cst_21 [1] : vector<8x32xf32> to vector<8xf32>
    %65 = vector.shape_cast %64 : vector<8xf32> to vector<8x1xf32>
    %cst_22 = arith.constant 3.200000e+01 : f32
    %66 = vector.broadcast %cst_22 : f32 to vector<8x1xf32>
    %67 = arith.divf %65, %66 : vector<8x1xf32>
    %68 = arith.mulf %63, %63 : vector<8x32xf32>
    %cst_23 = arith.constant dense<0.000000e+00> : vector<8xf32>
    %69 = vector.multi_reduction <add>, %68, %cst_23 [1] : vector<8x32xf32> to vector<8xf32>
    %70 = vector.shape_cast %69 : vector<8xf32> to vector<8x1xf32>
    %cst_24 = arith.constant 3.200000e+01 : f32
    %71 = vector.broadcast %cst_24 : f32 to vector<8x1xf32>
    %72 = arith.divf %70, %71 : vector<8x1xf32>
    %73 = vector.broadcast %67 : vector<8x1xf32> to vector<8x32xf32>
    %74 = arith.subf %63, %73 : vector<8x32xf32>
    %75 = arith.mulf %67, %67 : vector<8x1xf32>
    %76 = arith.subf %72, %75 : vector<8x1xf32>
    %cst_25 = arith.constant 9.99999997E-7 : f32
    %77 = vector.broadcast %cst_25 : f32 to vector<8x1xf32>
    %78 = arith.addf %76, %77 : vector<8x1xf32>
    %79 = math.rsqrt %78 : vector<8x1xf32>
    %80 = vector.broadcast %79 : vector<8x1xf32> to vector<8x32xf32>
    %81 = arith.mulf %74, %80 : vector<8x32xf32>
    %82 = arith.mulf %81, %47 : vector<8x32xf32>
    %83 = arith.truncf %82 : vector<8x32xf32> to vector<8x32xbf16>
    %c0_26 = arith.constant 0 : index
    %c0_27 = arith.constant 0 : index
    %c0_28 = arith.constant 0 : index
    %84 = vector.load %arg5[%c0_26, %c0_27, %c0_28] : memref<2x32x32xbf16, #tpu.memory_space<vmem>>, vector<1x32x32xbf16>
    %85 = vector.shape_cast %84 : vector<1x32x32xbf16> to vector<32x32xbf16>
    %cst_29 = arith.constant dense<0.000000e+00> : vector<8x32xf32>
    %86 = tpu.matmul %83, %85, %cst_29 {dimension_numbers = #tpu.dot_dimension_numbers<[1], [0], [0], [1], [0, 0, 1, 1], [], []>} : vector<8x32xbf16>, vector<32x32xbf16>, vector<8x32xf32> -> vector<8x32xf32>
    %87 = arith.addf %8, %86 : vector<8x32xf32>
    %c0_30 = arith.constant 0 : index
    %c0_31 = arith.constant 0 : index
    %c0_32 = arith.constant 0 : index
    %88 = vector.load %arg6[%c0_30, %c0_31, %c0_32] : memref<2x1x32xf32, #tpu.memory_space<vmem>>, vector<1x1x32xf32>
    %89 = vector.shape_cast %88 : vector<1x1x32xf32> to vector<1x32xf32>
    %90 = vector.broadcast %89 : vector<1x32xf32> to vector<8x32xf32>
    %91 = arith.addf %87, %90 : vector<8x32xf32>
    %cst_33 = arith.constant dense<0.000000e+00> : vector<8xf32>
    %92 = vector.multi_reduction <add>, %91, %cst_33 [1] : vector<8x32xf32> to vector<8xf32>
    %93 = vector.shape_cast %92 : vector<8xf32> to vector<8x1xf32>
    %cst_34 = arith.constant 3.200000e+01 : f32
    %94 = vector.broadcast %cst_34 : f32 to vector<8x1xf32>
    %95 = arith.divf %93, %94 : vector<8x1xf32>
    %96 = arith.mulf %91, %91 : vector<8x32xf32>
    %cst_35 = arith.constant dense<0.000000e+00> : vector<8xf32>
    %97 = vector.multi_reduction <add>, %96, %cst_35 [1] : vector<8x32xf32> to vector<8xf32>
    %98 = vector.shape_cast %97 : vector<8xf32> to vector<8x1xf32>
    %cst_36 = arith.constant 3.200000e+01 : f32
    %99 = vector.broadcast %cst_36 : f32 to vector<8x1xf32>
    %100 = arith.divf %98, %99 : vector<8x1xf32>
    %101 = vector.broadcast %95 : vector<8x1xf32> to vector<8x32xf32>
    %102 = arith.subf %91, %101 : vector<8x32xf32>
    %103 = arith.mulf %95, %95 : vector<8x1xf32>
    %104 = arith.subf %100, %103 : vector<8x1xf32>
    %cst_37 = arith.constant 9.99999997E-7 : f32
    %105 = vector.broadcast %cst_37 : f32 to vector<8x1xf32>
    %106 = arith.addf %104, %105 : vector<8x1xf32>
    %107 = math.rsqrt %106 : vector<8x1xf32>
    %108 = vector.broadcast %107 : vector<8x1xf32> to vector<8x32xf32>
    %109 = arith.mulf %102, %108 : vector<8x32xf32>
    %110 = arith.truncf %109 : vector<8x32xf32> to vector<8x32xbf16>
    %c1 = arith.constant 1 : index
    %c0_38 = arith.constant 0 : index
    %c0_39 = arith.constant 0 : index
    %111 = vector.load %arg3[%c1, %c0_38, %c0_39] : memref<2x32x128xbf16, #tpu.memory_space<vmem>>, vector<1x32x128xbf16>
    %112 = vector.shape_cast %111 : vector<1x32x128xbf16> to vector<32x128xbf16>
    %cst_40 = arith.constant dense<0.000000e+00> : vector<8x128xf32>
    %113 = tpu.matmul %110, %112, %cst_40 {dimension_numbers = #tpu.dot_dimension_numbers<[1], [0], [0], [1], [0, 0, 1, 1], [], []>} : vector<8x32xbf16>, vector<32x128xbf16>, vector<8x128xf32> -> vector<8x128xf32>
    %c1_41 = arith.constant 1 : index
    %c0_42 = arith.constant 0 : index
    %c0_43 = arith.constant 0 : index
    %114 = vector.load %arg4[%c1_41, %c0_42, %c0_43] : memref<2x1x128xf32, #tpu.memory_space<vmem>>, vector<1x1x128xf32>
    %115 = vector.shape_cast %114 : vector<1x1x128xf32> to vector<1x128xf32>
    %116 = vector.broadcast %115 : vector<1x128xf32> to vector<8x128xf32>
    %117 = arith.addf %113, %116 : vector<8x128xf32>
    %118 = arith.negf %117 : vector<8x128xf32>
    %119 = math.exp %118 : vector<8x128xf32>
    %cst_44 = arith.constant 1.000000e+00 : f32
    %120 = vector.broadcast %cst_44 : f32 to vector<8x128xf32>
    %121 = arith.addf %120, %119 : vector<8x128xf32>
    %122 = arith.divf %120, %121 : vector<8x128xf32>
    %123 = arith.mulf %117, %122 : vector<8x128xf32>
    %124 = vector.extract_strided_slice %123 {offsets = [0, 0], sizes = [8, 32], strides = [1, 1]} : vector<8x128xf32> to vector<8x32xf32>
    %125 = vector.extract_strided_slice %123 {offsets = [0, 32], sizes = [8, 32], strides = [1, 1]} : vector<8x128xf32> to vector<8x32xf32>
    %126 = vector.extract_strided_slice %123 {offsets = [0, 64], sizes = [8, 32], strides = [1, 1]} : vector<8x128xf32> to vector<8x32xf32>
    %127 = vector.extract_strided_slice %123 {offsets = [0, 96], sizes = [8, 32], strides = [1, 1]} : vector<8x128xf32> to vector<8x32xf32>
    %128 = arith.truncf %126 : vector<8x32xf32> to vector<8x32xbf16>
    %129 = arith.truncf %127 : vector<8x32xf32> to vector<8x32xbf16>
    %cst_45 = arith.constant dense<0.000000e+00> : vector<8x8xf32>
    %130 = tpu.matmul %128, %129, %cst_45 {dimension_numbers = #tpu.dot_dimension_numbers<[1], [1], [0], [0], [0, 0, 1, 0], [], []>} : vector<8x32xbf16>, vector<8x32xbf16>, vector<8x8xf32> -> vector<8x8xf32>
    %131 = arith.negf %130 : vector<8x8xf32>
    %132 = math.exp %131 : vector<8x8xf32>
    %cst_46 = arith.constant 1.000000e+00 : f32
    %133 = vector.broadcast %cst_46 : f32 to vector<8x8xf32>
    %134 = arith.addf %133, %132 : vector<8x8xf32>
    %135 = arith.divf %133, %134 : vector<8x8xf32>
    %136 = arith.mulf %130, %135 : vector<8x8xf32>
    %137 = arith.mulf %136, %14 : vector<8x8xf32>
    %138 = arith.truncf %137 : vector<8x8xf32> to vector<8x8xbf16>
    %139 = arith.truncf %125 : vector<8x32xf32> to vector<8x32xbf16>
    %cst_47 = arith.constant dense<0.000000e+00> : vector<8x32xf32>
    %140 = tpu.matmul %138, %139, %cst_47 {dimension_numbers = #tpu.dot_dimension_numbers<[1], [0], [0], [1], [0, 0, 1, 1], [], []>} : vector<8x8xbf16>, vector<8x32xbf16>, vector<8x32xf32> -> vector<8x32xf32>
    %cst_48 = arith.constant dense<0.000000e+00> : vector<8xf32>
    %141 = vector.multi_reduction <add>, %140, %cst_48 [1] : vector<8x32xf32> to vector<8xf32>
    %142 = vector.shape_cast %141 : vector<8xf32> to vector<8x1xf32>
    %cst_49 = arith.constant 3.200000e+01 : f32
    %143 = vector.broadcast %cst_49 : f32 to vector<8x1xf32>
    %144 = arith.divf %142, %143 : vector<8x1xf32>
    %145 = arith.mulf %140, %140 : vector<8x32xf32>
    %cst_50 = arith.constant dense<0.000000e+00> : vector<8xf32>
    %146 = vector.multi_reduction <add>, %145, %cst_50 [1] : vector<8x32xf32> to vector<8xf32>
    %147 = vector.shape_cast %146 : vector<8xf32> to vector<8x1xf32>
    %cst_51 = arith.constant 3.200000e+01 : f32
    %148 = vector.broadcast %cst_51 : f32 to vector<8x1xf32>
    %149 = arith.divf %147, %148 : vector<8x1xf32>
    %150 = vector.broadcast %144 : vector<8x1xf32> to vector<8x32xf32>
    %151 = arith.subf %140, %150 : vector<8x32xf32>
    %152 = arith.mulf %144, %144 : vector<8x1xf32>
    %153 = arith.subf %149, %152 : vector<8x1xf32>
    %cst_52 = arith.constant 9.99999997E-7 : f32
    %154 = vector.broadcast %cst_52 : f32 to vector<8x1xf32>
    %155 = arith.addf %153, %154 : vector<8x1xf32>
    %156 = math.rsqrt %155 : vector<8x1xf32>
    %157 = vector.broadcast %156 : vector<8x1xf32> to vector<8x32xf32>
    %158 = arith.mulf %151, %157 : vector<8x32xf32>
    %159 = arith.mulf %158, %124 : vector<8x32xf32>
    %160 = arith.truncf %159 : vector<8x32xf32> to vector<8x32xbf16>
    %c1_53 = arith.constant 1 : index
    %c0_54 = arith.constant 0 : index
    %c0_55 = arith.constant 0 : index
    %161 = vector.load %arg5[%c1_53, %c0_54, %c0_55] : memref<2x32x32xbf16, #tpu.memory_space<vmem>>, vector<1x32x32xbf16>
    %162 = vector.shape_cast %161 : vector<1x32x32xbf16> to vector<32x32xbf16>
    %cst_56 = arith.constant dense<0.000000e+00> : vector<8x32xf32>
    %163 = tpu.matmul %160, %162, %cst_56 {dimension_numbers = #tpu.dot_dimension_numbers<[1], [0], [0], [1], [0, 0, 1, 1], [], []>} : vector<8x32xbf16>, vector<32x32xbf16>, vector<8x32xf32> -> vector<8x32xf32>
    %164 = arith.addf %91, %163 : vector<8x32xf32>
    %c1_57 = arith.constant 1 : index
    %c0_58 = arith.constant 0 : index
    %c0_59 = arith.constant 0 : index
    %165 = vector.load %arg6[%c1_57, %c0_58, %c0_59] : memref<2x1x32xf32, #tpu.memory_space<vmem>>, vector<1x1x32xf32>
    %166 = vector.shape_cast %165 : vector<1x1x32xf32> to vector<1x32xf32>
    %167 = vector.broadcast %166 : vector<1x32xf32> to vector<8x32xf32>
    %168 = arith.addf %164, %167 : vector<8x32xf32>
    %169 = arith.truncf %168 : vector<8x32xf32> to vector<8x32xbf16>
    %c0_60 = arith.constant 0 : index
    %c0_61 = arith.constant 0 : index
    %170 = vector.load %arg7[%c0_60, %c0_61] : memref<32x64xbf16, #tpu.memory_space<vmem>>, vector<32x64xbf16>
    %cst_62 = arith.constant dense<0.000000e+00> : vector<8x64xf32>
    %171 = tpu.matmul %169, %170, %cst_62 {dimension_numbers = #tpu.dot_dimension_numbers<[1], [0], [0], [1], [0, 0, 1, 1], [], []>} : vector<8x32xbf16>, vector<32x64xbf16>, vector<8x64xf32> -> vector<8x64xf32>
    %c0_63 = arith.constant 0 : index
    %c0_64 = arith.constant 0 : index
    %172 = vector.load %arg8[%c0_63, %c0_64] : memref<1x64xf32, #tpu.memory_space<vmem>>, vector<1x64xf32>
    %173 = vector.broadcast %172 : vector<1x64xf32> to vector<8x64xf32>
    %174 = arith.addf %171, %173 : vector<8x64xf32>
    %cst_65 = arith.constant 0.000000e+00 : f32
    %175 = vector.broadcast %cst_65 : f32 to vector<8x64xf32>
    %176 = arith.maximumf %174, %175 : vector<8x64xf32>
    %177 = arith.truncf %176 : vector<8x64xf32> to vector<8x64xbf16>
    %c0_66 = arith.constant 0 : index
    %c0_67 = arith.constant 0 : index
    %178 = vector.load %arg9[%c0_66, %c0_67] : memref<64x32xbf16, #tpu.memory_space<vmem>>, vector<64x32xbf16>
    %cst_68 = arith.constant dense<0.000000e+00> : vector<8x32xf32>
    %179 = tpu.matmul %177, %178, %cst_68 {dimension_numbers = #tpu.dot_dimension_numbers<[1], [0], [0], [1], [0, 0, 1, 1], [], []>} : vector<8x64xbf16>, vector<64x32xbf16>, vector<8x32xf32> -> vector<8x32xf32>
    %c0_69 = arith.constant 0 : index
    %c0_70 = arith.constant 0 : index
    %180 = vector.load %arg10[%c0_69, %c0_70] : memref<1x32xf32, #tpu.memory_space<vmem>>, vector<1x32xf32>
    %181 = vector.broadcast %180 : vector<1x32xf32> to vector<8x32xf32>
    %182 = arith.addf %179, %181 : vector<8x32xf32>
    %cst_71 = arith.constant 0.000000e+00 : f32
    %183 = vector.broadcast %cst_71 : f32 to vector<8x32xf32>
    %184 = arith.maximumf %182, %183 : vector<8x32xf32>
    %185 = arith.truncf %184 : vector<8x32xf32> to vector<8x32xbf16>
    %c0_72 = arith.constant 0 : index
    %c0_73 = arith.constant 0 : index
    %186 = vector.load %arg11[%c0_72, %c0_73] : memref<32x128xbf16, #tpu.memory_space<vmem>>, vector<32x128xbf16>
    %cst_74 = arith.constant dense<0.000000e+00> : vector<8x128xf32>
    %187 = tpu.matmul %185, %186, %cst_74 {dimension_numbers = #tpu.dot_dimension_numbers<[1], [0], [0], [1], [0, 0, 1, 1], [], []>} : vector<8x32xbf16>, vector<32x128xbf16>, vector<8x128xf32> -> vector<8x128xf32>
    %c0_75 = arith.constant 0 : index
    %c0_76 = arith.constant 0 : index
    %188 = vector.load %arg12[%c0_75, %c0_76] : memref<1x128xf32, #tpu.memory_space<vmem>>, vector<1x128xf32>
    %189 = vector.broadcast %188 : vector<1x128xf32> to vector<8x128xf32>
    %190 = arith.addf %187, %189 : vector<8x128xf32>
    %c0_77 = arith.constant 0 : index
    %c0_78 = arith.constant 0 : index
    %191 = vector.load %arg13[%c0_77, %c0_78] : memref<8x128xf32, #tpu.memory_space<vmem>>, vector<8x128xf32>
    tpu.vector_store %arg13[%c0_77, %c0_78], %190 {strides = array<i32>} : memref<8x128xf32, #tpu.memory_space<vmem>>, vector<8x128xf32>,
    return
  }
  func.func @transform_0(%arg0: i32) -> (i32, i32) {
    %c0_i32 = arith.constant 0 : i32
    %c0_i32_0 = arith.constant 0 : i32
    return %arg0, %c0_i32 : i32, i32
  }
  func.func @transform_1(%arg0: i32) -> (i32, i32) {
    %c0_i32 = arith.constant 0 : i32
    %c0_i32_0 = arith.constant 0 : i32
    %c0_i32_1 = arith.constant 0 : i32
    return %c0_i32, %c0_i32_0 : i32, i32
  }
  func.func @transform_2(%arg0: i32) -> (i32, i32, i32) {
    %c0_i32 = arith.constant 0 : i32
    %c0_i32_0 = arith.constant 0 : i32
    %c0_i32_1 = arith.constant 0 : i32
    %c0_i32_2 = arith.constant 0 : i32
    return %c0_i32, %c0_i32_0, %c0_i32_1 : i32, i32, i32
  }
  func.func @transform_3(%arg0: i32) -> (i32, i32, i32) {
    %c0_i32 = arith.constant 0 : i32
    %c0_i32_0 = arith.constant 0 : i32
    %c0_i32_1 = arith.constant 0 : i32
    %c0_i32_2 = arith.constant 0 : i32
    return %c0_i32, %c0_i32_0, %c0_i32_1 : i32, i32, i32
  }
  func.func @transform_4(%arg0: i32) -> (i32, i32, i32) {
    %c0_i32 = arith.constant 0 : i32
    %c0_i32_0 = arith.constant 0 : i32
    %c0_i32_1 = arith.constant 0 : i32
    %c0_i32_2 = arith.constant 0 : i32
    return %c0_i32, %c0_i32_0, %c0_i32_1 : i32, i32, i32
  }
  func.func @transform_5(%arg0: i32) -> (i32, i32, i32) {
    %c0_i32 = arith.constant 0 : i32
    %c0_i32_0 = arith.constant 0 : i32
    %c0_i32_1 = arith.constant 0 : i32
    %c0_i32_2 = arith.constant 0 : i32
    return %c0_i32, %c0_i32_0, %c0_i32_1 : i32, i32, i32
  }
  func.func @transform_6(%arg0: i32) -> (i32, i32) {
    %c0_i32 = arith.constant 0 : i32
    %c0_i32_0 = arith.constant 0 : i32
    %c0_i32_1 = arith.constant 0 : i32
    return %c0_i32, %c0_i32_0 : i32, i32
  }
  func.func @transform_7(%arg0: i32) -> (i32, i32) {
    %c0_i32 = arith.constant 0 : i32
    %c0_i32_0 = arith.constant 0 : i32
    %c0_i32_1 = arith.constant 0 : i32
    return %c0_i32, %c0_i32_0 : i32, i32
  }
  func.func @transform_8(%arg0: i32) -> (i32, i32) {
    %c0_i32 = arith.constant 0 : i32
    %c0_i32_0 = arith.constant 0 : i32
    %c0_i32_1 = arith.constant 0 : i32
    return %c0_i32, %c0_i32_0 : i32, i32
  }
  func.func @transform_9(%arg0: i32) -> (i32, i32) {
    %c0_i32 = arith.constant 0 : i32
    %c0_i32_0 = arith.constant 0 : i32
    %c0_i32_1 = arith.constant 0 : i32
    return %c0_i32, %c0_i32_0 : i32, i32
  }
  func.func @transform_10(%arg0: i32) -> (i32, i32) {
    %c0_i32 = arith.constant 0 : i32
    %c0_i32_0 = arith.constant 0 : i32
    %c0_i32_1 = arith.constant 0 : i32
    return %c0_i32, %c0_i32_0 : i32, i32
  }
  func.func @transform_11(%arg0: i32) -> (i32, i32) {
    %c0_i32 = arith.constant 0 : i32
    %c0_i32_0 = arith.constant 0 : i32
    %c0_i32_1 = arith.constant 0 : i32
    return %c0_i32, %c0_i32_0 : i32, i32
  }
  func.func @transform_12(%arg0: i32) -> (i32, i32) {
    %c0_i32 = arith.constant 0 : i32
    %c0_i32_0 = arith.constant 0 : i32
    return %arg0, %c0_i32 : i32, i32
  }
}

</mosaic_0001>

<bundles_post_ra>
// kernel: ranking_gr_forward.1
= control target key start
LH: loop header
LB: loop body
LE: loop exit
PB: predicated region body
PF: predicated region fallthrough
CT: control target
= control target key end

     0   :  { %17 = vsyncpa [#allocation3], 0  ;;  %s2103_s0 = inlined_call_operand.vmem [shape: s32[16,1], index: 0, kind: input, shape index: {}]   ;;  %s2104_s1 = inlined_call_operand.vmem [shape: bf16[64,32], index: 1, kind: input, shape index: {}]   ;;  %s2105_s2 = inlined_call_operand.vmem [shape: bf16[2,32,128], index: 2, kind: input, shape index: {}]   ;;  %s2106_s3 = inlined_call_operand.hbm [shape: f32[2,1,128], index: 3, kind: input, shape index: {}]   ;;  %s2107_s4 = inlined_call_operand.vmem [shape: bf16[2,32,32], index: 4, kind: input, shape index: {}]   ;;  %s2108_s5 = inlined_call_operand.hbm [shape: f32[2,1,32], index: 5, kind: input, shape index: {}]   ;;  %s2109_s6 = inlined_call_operand.vmem [shape: bf16[32,64], index: 6, kind: input, shape index: {}]   ;;  %s2110_s7 = inlined_call_operand.vmem [shape: f32[1,64], index: 7, kind: input, shape index: {}]   ;;  %s2111_s8 = inlined_call_operand.vmem [shape: bf16[64,32], index: 8, kind: input, shape index: {}]   ;;  %s2112_s9 = inlined_call_operand.vmem [shape: f32[1,32], index: 9, kind: input, shape index: {}]   ;;  %s2113_s10 = inlined_call_operand.vmem [shape: bf16[32,128], index: 10, kind: input, shape index: {}]   ;;  %s2114_s11 = inlined_call_operand.vmem [shape: f32[1,128], index: 11, kind: input, shape index: {}]   ;;  %s2115_s12 = inlined_call_operand.vmem [shape: f32[16,128], index: 12, kind: output, shape index: {}]  }
   0x1   :  { %18 = vsyncpa [#allocation5], 0  ;;  %s1825_s21 = smov 0  }
   0x2 LB: > { %s1831_s22 = sadd.s32 4294967295, %s1748_s21   ;;  %p1401_p0 = scmp.ge.s32.totalorder %s1748_s21, 1  ;;  %s1748_s21 = sphi %s1825_s21, %s24_s21  }
   0x3   : > { %p312_p1 = scmp.lt.s32.totalorder %s1748_s21, 3  ;;  %s1750_s23 = smov [#allocation2]  }
   0x4   : > { %s330_s24 = sshll.u32 %s1750_s23, 4  ;;  %p2116_p3 = scmp.eq.s32.totalorder %s1831_s22, 0  ;;  %s331_s24 = int_to_ptr.vmem [resolvable:$true] %s330_s24 }
   0x5   : > { %p1835_p2 = pnand %p1401_p0, %p312_p1  ;;  %s1751_s26 = smov [#allocation4]  }
   0x6   : > { %s346_s27 = sshll.u32 %s1751_s26, 4  ;;  %s1678_s13 = scalar_lea.hbm %s2106_s3, 32  ;;  %s1848_s27 = int_to_ptr.vmem [resolvable:$true] %s346_s27 }
   0x7   : > { %s2118_s25 = scalar_select %p1835_p2, 1, 0 }
   0x8   : > { %p1604_p4 = pneg %p1835_p2  ;;  %p1679_p6 = scmp.ne.s32.totalorder %s2106_s3, %s1678_s13 }
   0x9   : > { %p1685_p10 = scmp.lt.u32.totalorder %s1678_s13, %s2106_s3 }
   0xa   : > { %p1844_p5 = pnand %p2116_p3, %p1604_p4 }
   0xc   : > { %p1680_p7 = pneg %p1844_p5 }
   0xe   : > { %p1681_p8 = pnand %p1680_p7, %p1679_p6 }
  0x10   : > { %p1682_p9 = pneg %p1681_p8 }
  0x12   : > { %p1687_p11 = pnand %p1685_p10, %p1682_p9 }
  0x14   : > { %1690 = shalt.err (!%p1687_p11)
}
  0x15   : > { %s1691_s18 = scalar_lea.vmem %s331_s24, 32  ;;  %p1699_p1 = scmp.lt.s32.totalorder %s331_s24, %s331_s24 }
  0x16   : > { %p1692_p12 = scmp.ne.s32.totalorder %s331_s24, %s1691_s18  ;;  %p1700_p4 = scmp.lt.s32.totalorder %s1691_s18, %s1691_s18 }
  0x18   : > { %p1694_p13 = pnand %p1692_p12, %p1680_p7  ;;  %p1701_p3 = por %p1700_p4, %p1699_p1 }
  0x1a   : > { %p1695_p0 = pneg %p1694_p13 }
  0x1c   : > { %p1702_p2 = pnand %p1701_p3, %p1695_p0 }
  0x1e   : > { %1705 = shalt.err (!%p1702_p2)
}
  0x1f   : > { %s1752_s19 = smov 16   ;;  %s1753_s20 = smov 1  }
  0x20   : > { %1607 = dma.hbm_to_vmem [thread:$0]  (!%p1844_p5), %s2106_s3, 32, %s331_s24, [#allocation3], %s1752_s19, %s1752_s19, %s1753_s20  }
  0x21   : > { %s1706_s13 = scalar_lea.hbm %s2108_s5, 32 }
  0x22   : > { %p1707_p6 = scmp.ne.s32.totalorder %s2108_s5, %s1706_s13  ;;  %p1713_p8 = scmp.lt.u32.totalorder %s1706_s13, %s2108_s5 }
  0x24   : > { %p1709_p2 = pnand %p1707_p6, %p1680_p7 }
  0x26   : > { %p1710_p3 = pneg %p1709_p2 }
  0x28   : > { %p1715_p9 = pnand %p1713_p8, %p1710_p3 }
  0x2a   : > { %1718 = shalt.err (!%p1715_p9)
}
  0x2b   : > { %s1719_s24 = scalar_lea.vmem %s1848_s27, 32  ;;  %p1727_p13 = scmp.lt.s32.totalorder %s1848_s27, %s1848_s27 }
  0x2c   : > { %p1720_p10 = scmp.ne.s32.totalorder %s1848_s27, %s1719_s24  ;;  %p1728_p0 = scmp.lt.s32.totalorder %s1719_s24, %s1719_s24 }
  0x2e   : > { %p1722_p11 = pnand %p1720_p10, %p1680_p7  ;;  %p1729_p1 = por %p1728_p0, %p1727_p13 }
  0x30   : > { %p1723_p12 = pneg %p1722_p11 }
  0x32   : > { %p1730_p4 = pnand %p1729_p1, %p1723_p12 }
  0x34   : > { %1733 = shalt.err (!%p1730_p4)
}
  0x35   : > { %1610 = dma.hbm_to_vmem [thread:$0]  (!%p1844_p5), %s2108_s5, 32, %s1848_s27, [#allocation5], %s1752_s19, %s1752_s19, %s1753_s20  }
  0x36   : > { %p2120_p6 = scmp.ne.s32.totalorder %s2118_s25, 0 }
  0x37   : > { %p2121_p2 = scmp.eq.s32.totalorder (!%p2120_p6), %s1831_s22, 0 }
  0x38   : > { %387 = sbr.rel (%p2120_p6) target bundleno = 3818 (0xeea), region = 68 }
  0x3f   : > { %1739 = dma.done.wait (%p2121_p2), [#allocation3], 32   ;;  %p2122_p7 = pmov %p2121_p2 }
  0x40   : > { %p2123_p3 = pmov %p2121_p2 }
  0x41   : > { %1741 = vsyncadd (%p2122_p7), [#allocation3], 4294967264 }
  0x42   : > { %1743 = dma.done.wait (%p2123_p3), [#allocation5], 32   ;;  %p2124_p8 = pmov %p2121_p2 }
  0x43   : > { %p431_p9 = scmp.lt.s32.totalorder %s1831_s22, 1  ;;  %v1754_v0 = vmov 0   ;;  %v1755_v1 = vmov 0.0   ;;  %v1634_v3 = vld [vmem:[%s2104_s1] sm:$0xff]   ;;  %v1635_v4 = vld [vmem:[%s2104_s1 + $0x8] sm:$0xff]   ;;  %vm1756_vm0 = vmmov 0   ;;  %v441_v7 = vlaneseq }
  0x44   : > { %1745 = vsyncadd (%p2124_p8), [#allocation5], 4294967264  ;;  %1633 = vset.pattern.permute.xlu0 %v1754_v0  ;;  %1500 = vmatprep.subr.bf16.mxu0 %v1755_v1  ;;  %v1636_v5 = vld [vmem:[%s2104_s1 + $0x10] sm:$0xff]   ;;  %v1637_v6 = vld [vmem:[%s2104_s1 + $0x18] sm:$0xff]   ;;  %vm482_vm2 = vcmask 523264   ;;  %vm530_vm3 = vcmask 261120  }
  0x45   : > { %s2126_s22 = smov (!%p431_p9, %s1831_s22), 1  ;;  %1512 = vmatprep.subr.bf16.mxu1 %v1755_v1  ;;  %1501 = vmatpush3.bf16.msra.mxu0 %v1634_v3  ;;  %v1940_v8 = vand.u32 127, %v441_v7  ;;  %v1638_v19 = vld [vmem:[%s2105_s2] sm:$0xff]   ;;  %v1639_v20 = vld [vmem:[%s2105_s2 + $0x8] sm:$0xff]   ;;  %s1757_s27 = smov 32   ;;  %vm688_vm4 = vcmask 1043456  }
  0x46   : > { %s1408_s25 = sshll.u32 %s2126_s22, 3  ;;  %1502 = vmatprep.subr.bf16.mxu0 %v1755_v1  ;;  %1508 = vmatprep.mubr.msk.bf16.mxu0 %vm1756_vm0, %v1755_v1  ;;  %v1416_v32 = vld [vmem:[#allocation2] ss:$0 sm:$0xff]  ;;  %s1758_s28 = smov 64   ;;  %v527_v56 = vshrl.u32 %v441_v7, 7  ;;  %vm684_vm6 = vcmask 64512  }
  0x47   : > { %s434_s19 = scalar_lea.vmem %s2103_s0, %s1408_s25  ;;  %1516 = vmatprep.mubr.msk.bf16.mxu1 %vm1756_vm0, %v1755_v1  ;;  %1513 = vmatpush3.bf16.msra.mxu1 %v1638_v19  ;;  %v1641_v7 = vld [vmem:[%s2107_s4 + $0x8] sm:$0xff]   ;;  %s438_s15 = scalar_lea.vmem %s2115_s12, %s1408_s25 }
  0x48   : > { %v440_v2 = vld [vmem:[%s434_s19] sm:$0xff]  ;;  %1514 = vmatprep.subr.bf16.mxu1 %v1755_v1  ;;  %s1759_s19 = smov 96   ;;  %vm528_vm5 = vcmp.le.s32.totalorder %v1940_v8, %v527_v56 }
  0x49   : > { %444 = vperm.xlu0 %1633, %v440_v2   ;;  %1503 = vmatpush3.bf16.msra.mxu0 %v1635_v4  ;;  %v1983_v58 = vsel %vm528_vm5, 0.125, %v1755_v1 }
  0x4a   : > { %1504 = vmatprep.subr.bf16.mxu0 %v1755_v1 }
  0x4b   : > { %1515 = vmatpush3.bf16.msra.mxu1 %v1639_v20 }
  0x4c   : > { %1520 = vmatprep.subr.bf16.mxu1 %v1755_v1 }
  0x4d   : > { %1505 = vmatpush3.bf16.msra.mxu0 %v1636_v5 }
  0x4e   : > { %1506 = vmatprep.subr.bf16.mxu0 %v1755_v1 }
  0x51   : > { %1507 = vmatpush3.bf16.msra.mxu0 %v1637_v6  ;;  %v1640_v6 = vld [vmem:[%s2107_s4] sm:$0xff]  }
  0x52   : > { %1526 = vmatprep.subr.bf16.mxu0 %v1755_v1 }
  0xc8   : > { %v445_v9 = vpop.permute.xlu0 %444 }
  0xc9   : > { %vm446_vm1 = vcmp.eq.s32.totalorder %v1940_v8, %v445_v9 }
  0xca   : > { %v1410_v10 = vsel %vm446_vm1, 1.0, %v1755_v1 }
  0xcb   : > { %v449_v11 = vpack.c.bf16 %v1410_v10, %v1410_v10 }
  0xcd   : > { %1509 = vmatmul.mubr.msk.bf16.vlgmr.msra.gmra.mrb[0].mxu0 %vm482_vm2, %v449_v11 }
  0xce   : > { %1528 = vmatprep.mubr.msk.bf16.mxu0 %vm1756_vm0, %v1755_v1 }
 0x1a0   : > { %v1947_v12 = vpop.f32.mrb[0].mxu0 }
 0x1a1   : > { %v1510_v13 = vpop.f32.mrb[1].mxu0  ;;  %v531_v14 = vsel %vm530_vm3, %v1947_v12, 0.0  ;;  %v536_v15 = vmul.f32 %v1947_v12, %v1947_v12 }
 0x1a2   : > { %532 = vadd.xlane.f32.xlu0 %v531_v14  ;;  %v523_v16 = vpop.f32.mrb[2].mxu0 }
 0x1a3   : > { %v1511_v17 = vpop.f32.mrb[3].mxu0  ;;  %v537_v18 = vsel %vm530_vm3, %v536_v15, 0.0 }
 0x1a4   : > { %538 = vadd.xlane.f32.xlu1 %v537_v18 }
 0x22f   : > { %v533_v21 = vpop.xlane.xlu0 %532 }
 0x230   : > { %v535_v22 = vmul.f32 0.03125, %v533_v21 }
 0x231   : > { %v539_v23 = vpop.xlane.xlu1 %538 }
 0x232   : > { %v542_v24 = vmul.f32 %v535_v22, %v535_v22  ;;  %v540_v25 = vmul.f32 0.03125, %v539_v23  ;;  %v541_v28 = vsub.f32 %v1947_v12, %v535_v22  ;;  %v1427_v22 = vld [vmem:[#allocation4] ss:$0 sm:$0xff] }
 0x234   : > { %v543_v26 = vsub.f32 %v540_v25, %v542_v24 }
 0x236   : > { %v544_v27 = vadd.f32 1e-06, %v543_v26 }
 0x238   : > { %1654 = vrsqrt.f32 %v544_v27 }
 0x242   : > { %v1655_v29 = vpop.eup %1654 }
 0x243   : > { %v546_v30 = vmul.f32 %v1655_v29, %v541_v28 }
 0x245   : > { %v547_v31 = vpack.c.bf16 %v546_v30, %v546_v30 }
 0x247   : > { %1517 = vmatmul.mubr.msk.bf16.vlgmr.msra.gmra.mrb[0].mxu1 %vm530_vm3, %v547_v31  ;;  %v1642_v31 = vld [vmem:[%s2105_s2 + $0x10] sm:$0xff]  }
 0x248   : > { %1522 = vmatprep.mubr.msk.bf16.mxu1 %vm1756_vm0, %v1755_v1 }
 0x31a   : > { %v608_v33 = vpop.f32.mrb[0].mxu1 }
 0x31b   : > { %v609_v34 = vadd.f32 %v1416_v32, %v608_v33  ;;  %v1518_v35 = vpop.f32.mrb[1].mxu1 }
 0x31c   : > { %v611_v36 = vpop.f32.mrb[2].mxu1 }
 0x31d   : > { %v1420_v37 = vmul.f32 -1.442695, %v609_v34  ;;  %v1519_v38 = vpop.f32.mrb[3].mxu1 }
 0x31f   : > { %1656 = vpow2.f32 %v1420_v37 }
 0x329   : > { %v1657_v39 = vpop.eup %1656 }
 0x32a   : > { %v617_v40 = vadd.f32 1.0, %v1657_v39 }
 0x32c   : > { %1658 = vrcp.f32 %v617_v40 }
 0x336   : > { %v1659_v41 = vpop.eup %1658 }
 0x337   : > { %v1966_v42 = vmul.f32 %v1659_v41, %v609_v34 }
 0x339   : > { %v621_v43 = vpack.c.bf16 %v1966_v42, %v1966_v42 }
 0x33b   : > { %625 = vrot.lane.b32.xlu1 %v621_v43, %s1757_s27 }
 0x33f   : > { %623 = vrot.lane.b32.xlu1 %v621_v43, %s1758_s28 }
 0x343   : > { %682 = vrot.lane.b32.xlu1 %v621_v43, %s1759_s19  ;;  %v1432_v43 = vld [vmem:[#allocation2 + $0x1] ss:$0 sm:$0xff] }
 0x3ad   : > { %v626_v44 = vpop.permute.xlu1 %625 }
 0x3ae   : > { %v631_v45 = vsel %vm530_vm3, %v626_v44, 0 }
 0x3af   : > { %1521 = vmatpush3.bf16.xpose.msra.mxu1 %v631_v45 }
 0x3b0   : > { %1532 = vmatprep.subr.bf16.mxu1 %v1755_v1 }
 0x3b1   : > { %v624_v46 = vpop.permute.xlu1 %623 }
 0x3b5   : > { %v683_v47 = vpop.permute.xlu1 %682 }
 0x3b6   : > { %v690_v48 = vsel %vm688_vm4, %v683_v47, 0  ;;  %1523 = vmatmul.mubr.msk.bf16.vlgmr.msra.gmra.mrb[4].mxu1 %vm530_vm3, %v624_v46 }
 0x3b7   : > { %1527 = vmatpush3.bf16.msra.mxu0 %v690_v48  ;;  %1536 = vmatprep.mubr.msk.bf16.mxu1 %vm1756_vm0, %v1755_v1 }
 0x3b8   : > { %1540 = vmatprep.subr.bf16.mxu0 %v1755_v1  ;;  %1533 = vmatpush3.bf16.msra.mxu1 %v1640_v6 }
 0x3b9   : > { %1534 = vmatprep.subr.bf16.mxu1 %v1755_v1 }
 0x3bc   : > { %1535 = vmatpush3.bf16.msra.mxu1 %v1641_v7 }
 0x3bd   : > { %1548 = vmatprep.subr.bf16.mxu1 %v1755_v1 }
 0x489   : > { %v667_v49 = vpop.f32.mrb[4].mxu1 }
 0x48a   : > { %v1422_v50 = vmul.f32 -1.442695, %v667_v49  ;;  %v1524_v51 = vpop.f32.mrb[5].mxu1 }
 0x48b   : > { %v670_v52 = vpop.f32.mrb[6].mxu1 }
 0x48c   : > { %1660 = vpow2.f32 %v1422_v50  ;;  %v1525_v53 = vpop.f32.mrb[7].mxu1 }
 0x496   : > { %v1661_v54 = vpop.eup %1660 }
 0x497   : > { %v676_v55 = vadd.f32 1.0, %v1661_v54 }
 0x499   : > { %1662 = vrcp.f32 %v676_v55 }
 0x4a3   : > { %v1663_v57 = vpop.eup %1662 }
 0x4a4   : > { %v679_v59 = vmul.f32 %v1663_v57, %v667_v49 }
 0x4a6   : > { %v680_v60 = vmul.f32 %v679_v59, %v1983_v58 }
 0x4a8   : > { %v681_v61 = vpack.c.bf16 %v680_v60, %v680_v60 }
 0x4aa   : > { %1529 = vmatmul.mubr.msk.bf16.vlgmr.msra.gmra.mrb[4].mxu0 %vm684_vm6, %v681_v61 }
 0x4ab   : > { %1544 = vmatprep.mubr.msk.bf16.mxu0 %vm1756_vm0, %v1755_v1  ;;  %1541 = vmatpush3.bf16.msra.mxu0 %v1642_v31  ;;  %v1646_v31 = vld [vmem:[%s2109_s6] sm:$0xff]  }
 0x4ac   : > { %1542 = vmatprep.subr.bf16.mxu0 %v1755_v1 }
 0x57d   : > { %v726_v62 = vpop.f32.mrb[4].mxu0 }
 0x57e   : > { %v1530_v63 = vpop.f32.mrb[5].mxu0  ;;  %v732_v0 = vsel %vm530_vm3, %v726_v62, 0.0  ;;  %v736_v2 = vmul.f32 %v726_v62, %v726_v62 }
 0x57f   : > { %733 = vadd.xlane.f32.xlu1 %v732_v0  ;;  %v729_v3 = vpop.f32.mrb[6].mxu0 }
 0x580   : > { %v1531_v4 = vpop.f32.mrb[7].mxu0  ;;  %v737_v5 = vsel %vm530_vm3, %v736_v2, 0.0 }
 0x581   : > { %738 = vadd.xlane.f32.xlu0 %v737_v5 }
 0x60c   : > { %v734_v8 = vpop.xlane.xlu1 %733 }
 0x60d   : > { %v735_v9 = vmul.f32 0.03125, %v734_v8 }
 0x60e   : > { %v739_v10 = vpop.xlane.xlu0 %738 }
 0x60f   : > { %v742_v11 = vmul.f32 %v735_v9, %v735_v9  ;;  %v740_v13 = vmul.f32 0.03125, %v739_v10  ;;  %v741_v16 = vsub.f32 %v726_v62, %v735_v9 }
 0x611   : > { %v743_v14 = vsub.f32 %v740_v13, %v742_v11 }
 0x613   : > { %v744_v15 = vadd.f32 1e-06, %v743_v14 }
 0x615   : > { %1664 = vrsqrt.f32 %v744_v15 }
 0x61f   : > { %v1665_v17 = vpop.eup %1664 }
 0x620   : > { %v746_v18 = vmul.f32 %v1665_v17, %v741_v16  ;;  %v1645_v17 = vld [vmem:[%s2107_s4 + $0x18] sm:$0xff]  }
 0x622   : > { %v747_v19 = vmul.f32 %v746_v18, %v1966_v42 }
 0x624   : > { %v748_v20 = vpack.c.bf16 %v747_v19, %v747_v19 }
 0x626   : > { %1537 = vmatmul.mubr.msk.bf16.vlgmr.msra.gmra.mrb[8].mxu1 %vm530_vm3, %v748_v20 }
 0x627   : > { %1550 = vmatprep.mubr.msk.bf16.mxu1 %vm1756_vm0, %v1755_v1 }
 0x6f9   : > { %v802_v21 = vpop.f32.mrb[8].mxu1 }
 0x6fa   : > { %v808_v23 = vadd.f32 %v802_v21, %v1947_v12  ;;  %v1538_v24 = vpop.f32.mrb[9].mxu1  ;;  %v1643_v12 = vld [vmem:[%s2105_s2 + $0x18] sm:$0xff]  }
 0x6fb   : > { %v805_v25 = vpop.f32.mrb[10].mxu1  ;;  %1543 = vmatpush3.bf16.msra.mxu0 %v1643_v12  ;;  %v1647_v12 = vld [vmem:[%s2109_s6 + $0x8] sm:$0xff]  }
 0x6fc   : > { %v2004_v26 = vadd.f32 %v1427_v22, %v808_v23  ;;  %v1539_v27 = vpop.f32.mrb[11].mxu1  ;;  %1554 = vmatprep.subr.bf16.mxu0 %v1755_v1 }
 0x6fe   : > { %v817_v28 = vsel %vm530_vm3, %v2004_v26, 0.0  ;;  %v821_v29 = vmul.f32 %v2004_v26, %v2004_v26 }
 0x6ff   : > { %818 = vadd.xlane.f32.xlu0 %v817_v28 }
 0x700   : > { %v822_v30 = vsel %vm530_vm3, %v821_v29, 0.0 }
 0x703   : > { %823 = vadd.xlane.f32.xlu0 %v822_v30 }
 0x78c   : > { %v819_v32 = vpop.xlane.xlu0 %818 }
 0x78d   : > { %v820_v33 = vmul.f32 0.03125, %v819_v32  ;;  %v1648_v32 = vld [vmem:[%s2111_s8] sm:$0xff]  }
 0x78f   : > { %v827_v35 = vmul.f32 %v820_v33, %v820_v33  ;;  %v826_v39 = vsub.f32 %v2004_v26, %v820_v33  ;;  %v1649_v33 = vld [vmem:[%s2111_s8 + $0x8] sm:$0xff]  }
 0x790   : > { %v824_v34 = vpop.xlane.xlu0 %823 }
 0x791   : > { %v825_v36 = vmul.f32 0.03125, %v824_v34 }
 0x793   : > { %v828_v37 = vsub.f32 %v825_v36, %v827_v35  ;;  %v1447_v35 = vld [vmem:[#allocation4 + $0x1] ss:$0 sm:$0xff] }
 0x795   : > { %v829_v38 = vadd.f32 1e-06, %v828_v37 }
 0x797   : > { %1666 = vrsqrt.f32 %v829_v38 }
 0x7a1   : > { %v1667_v40 = vpop.eup %1666 }
 0x7a2   : > { %v831_v41 = vmul.f32 %v1667_v40, %v826_v39 }
 0x7a4   : > { %v832_v42 = vpack.c.bf16 %v831_v41, %v831_v41 }
 0x7a6   : > { %1545 = vmatmul.mubr.msk.bf16.vlgmr.msra.gmra.mrb[8].mxu0 %vm530_vm3, %v832_v42  ;;  %v1650_v42 = vld [vmem:[%s2111_s8 + $0x10] sm:$0xff]  }
 0x7a7   : > { %1556 = vmatprep.mubr.msk.bf16.mxu0 %vm1756_vm0, %v1755_v1 }
 0x879   : > { %v895_v44 = vpop.f32.mrb[8].mxu0 }
 0x87a   : > { %v896_v45 = vadd.f32 %v1432_v43, %v895_v44  ;;  %v1546_v46 = vpop.f32.mrb[9].mxu0  ;;  %v1448_v43 = vld [vmem:[%s2110_s7] ss:$0 sm:$0xff] }
 0x87b   : > { %v898_v47 = vpop.f32.mrb[10].mxu0 }
 0x87c   : > { %v1436_v48 = vmul.f32 -1.442695, %v896_v45  ;;  %v1547_v49 = vpop.f32.mrb[11].mxu0 }
 0x87e   : > { %1668 = vpow2.f32 %v1436_v48 }
 0x888   : > { %v1669_v50 = vpop.eup %1668 }
 0x889   : > { %v904_v51 = vadd.f32 1.0, %v1669_v50 }
 0x88b   : > { %1670 = vrcp.f32 %v904_v51  ;;  %v1652_v51 = vld [vmem:[%s2113_s10] sm:$0xff]  }
 0x895   : > { %v1671_v52 = vpop.eup %1670 }
 0x896   : > { %v907_v53 = vmul.f32 %v1671_v52, %v896_v45  ;;  %v1653_v52 = vld [vmem:[%s2113_s10 + $0x8] sm:$0xff]  }
 0x898   : > { %v908_v54 = vpack.c.bf16 %v907_v53, %v907_v53 }
 0x89a   : > { %910 = vrot.lane.b32.xlu1 %v908_v54, %s1758_s28  ;;  %912 = vrot.lane.b32.xlu0 %v908_v54, %s1757_s27 }
 0x89e   : > { %969 = vrot.lane.b32.xlu0 %v908_v54, %s1759_s19 }
 0x90c   : > { %v913_v55 = vpop.permute.xlu0 %912  ;;  %v911_v60 = vpop.permute.xlu1 %910 }
 0x90d   : > { %v918_v56 = vsel %vm530_vm3, %v913_v55, 0 }
 0x90e   : > { %1549 = vmatpush3.bf16.xpose.msra.mxu1 %v918_v56 }
 0x90f   : > { %1560 = vmatprep.subr.bf16.mxu1 %v1755_v1 }
 0x910   : > { %v970_v57 = vpop.permute.xlu0 %969 }
 0x911   : > { %v975_v59 = vsel %vm688_vm4, %v970_v57, 0 }
 0x912   : > { %1555 = vmatpush3.bf16.msra.mxu0 %v975_v59 }
 0x913   : > { %1568 = vmatprep.subr.bf16.mxu0 %v1755_v1 }
 0x915   : > { %1551 = vmatmul.mubr.msk.bf16.vlgmr.msra.gmra.mrb[12].mxu1 %vm530_vm3, %v911_v60 }
 0x916   : > { %1564 = vmatprep.mubr.msk.bf16.mxu1 %vm1756_vm0, %v1755_v1 }
 0x9e8   : > { %v954_v61 = vpop.f32.mrb[12].mxu1 }
 0x9e9   : > { %v1438_v62 = vmul.f32 -1.442695, %v954_v61  ;;  %v1552_v63 = vpop.f32.mrb[13].mxu1 }
 0x9ea   : > { %v957_v0 = vpop.f32.mrb[14].mxu1 }
 0x9eb   : > { %1672 = vpow2.f32 %v1438_v62  ;;  %v1553_v2 = vpop.f32.mrb[15].mxu1 }
 0x9f5   : > { %v1673_v3 = vpop.eup %1672 }
 0x9f6   : > { %v963_v4 = vadd.f32 1.0, %v1673_v3 }
 0x9f8   : > { %1674 = vrcp.f32 %v963_v4 }
 0xa02   : > { %v1675_v5 = vpop.eup %1674 }
 0xa03   : > { %v966_v6 = vmul.f32 %v1675_v5, %v954_v61 }
 0xa05   : > { %v967_v7 = vmul.f32 %v966_v6, %v1983_v58  ;;  %v1644_v58 = vld [vmem:[%s2107_s4 + $0x10] sm:$0xff]  }
 0xa06   : > { %1561 = vmatpush3.bf16.msra.mxu1 %v1644_v58 }
 0xa07   : > { %v968_v8 = vpack.c.bf16 %v967_v7, %v967_v7  ;;  %1562 = vmatprep.subr.bf16.mxu1 %v1755_v1 }
 0xa09   : > { %1557 = vmatmul.mubr.msk.bf16.vlgmr.msra.gmra.mrb[12].mxu0 %vm684_vm6, %v968_v8 }
 0xa0a   : > { %1572 = vmatprep.mubr.msk.bf16.mxu0 %vm1756_vm0, %v1755_v1  ;;  %1563 = vmatpush3.bf16.msra.mxu1 %v1645_v17 }
 0xa0b   : > { %1576 = vmatprep.subr.bf16.mxu1 %v1755_v1  ;;  %1569 = vmatpush3.bf16.msra.mxu0 %v1646_v31 }
 0xa0c   : > { %1570 = vmatprep.subr.bf16.mxu0 %v1755_v1 }
 0xa0f   : > { %1571 = vmatpush3.bf16.msra.mxu0 %v1647_v12 }
 0xa10   : > { %1588 = vmatprep.subr.bf16.mxu0 %v1755_v1 }
 0xadc   : > { %v1011_v9 = vpop.f32.mrb[12].mxu0 }
 0xadd   : > { %v1558_v10 = vpop.f32.mrb[13].mxu0  ;;  %v1017_v11 = vsel %vm530_vm3, %v1011_v9, 0.0  ;;  %v1021_v13 = vmul.f32 %v1011_v9, %v1011_v9 }
 0xade   : > { %1018 = vadd.xlane.f32.xlu0 %v1017_v11  ;;  %v1014_v14 = vpop.f32.mrb[14].mxu0 }
 0xadf   : > { %v1559_v15 = vpop.f32.mrb[15].mxu0  ;;  %v1022_v16 = vsel %vm530_vm3, %v1021_v13, 0.0 }
 0xae0   : > { %1023 = vadd.xlane.f32.xlu1 %v1022_v16 }
 0xb6b   : > { %v1019_v18 = vpop.xlane.xlu0 %1018 }
 0xb6c   : > { %v1020_v19 = vmul.f32 0.03125, %v1019_v18 }
 0xb6d   : > { %v1024_v20 = vpop.xlane.xlu1 %1023 }
 0xb6e   : > { %v1027_v21 = vmul.f32 %v1020_v19, %v1020_v19  ;;  %v1025_v22 = vmul.f32 0.03125, %v1024_v20  ;;  %v1026_v25 = vsub.f32 %v1011_v9, %v1020_v19 }
 0xb70   : > { %v1028_v23 = vsub.f32 %v1025_v22, %v1027_v21 }
 0xb72   : > { %v1029_v24 = vadd.f32 1e-06, %v1028_v23 }
 0xb74   : > { %1676 = vrsqrt.f32 %v1029_v24 }
 0xb7e   : > { %v1677_v27 = vpop.eup %1676 }
 0xb7f   : > { %v1031_v28 = vmul.f32 %v1677_v27, %v1026_v25 }
 0xb81   : > { %v1032_v29 = vmul.f32 %v1031_v28, %v907_v53  ;;  %v1452_v53 = vld [vmem:[%s2112_s9] ss:$0 sm:$0xff] }
 0xb83   : > { %v1033_v30 = vpack.c.bf16 %v1032_v29, %v1032_v29 }
 0xb85   : > { %1565 = vmatmul.mubr.msk.bf16.vlgmr.msra.gmra.mrb[16].mxu1 %vm530_vm3, %v1033_v30 }
 0xb86   : > { %1584 = vmatprep.mubr.msk.bf16.mxu1 %vm1756_vm0, %v1755_v1  ;;  %1577 = vmatpush3.bf16.msra.mxu1 %v1648_v32 }
 0xb87   : > { %1578 = vmatprep.subr.bf16.mxu1 %v1755_v1 }
 0xb8a   : > { %1579 = vmatpush3.bf16.msra.mxu1 %v1649_v33 }
 0xb8b   : > { %1580 = vmatprep.subr.bf16.mxu1 %v1755_v1 }
 0xb8e   : > { %1581 = vmatpush3.bf16.msra.mxu1 %v1650_v42 }
 0xb8f   : > { %1582 = vmatprep.subr.bf16.mxu1 %v1755_v1 }
 0xc58   : > { %v1088_v34 = vpop.f32.mrb[16].mxu1 }
 0xc59   : > { %v1094_v36 = vadd.f32 %v1088_v34, %v2004_v26  ;;  %v1566_v37 = vpop.f32.mrb[17].mxu1  ;;  %v1651_v26 = vld [vmem:[%s2111_s8 + $0x18] sm:$0xff]  }
 0xc5a   : > { %v1091_v38 = vpop.f32.mrb[18].mxu1  ;;  %1583 = vmatpush3.bf16.msra.mxu1 %v1651_v26 }
 0xc5b   : > { %v1103_v39 = vadd.f32 %v1447_v35, %v1094_v36  ;;  %v1567_v40 = vpop.f32.mrb[19].mxu1 }
 0xc5d   : > { %v1104_v41 = vpack.c.bf16 %v1103_v39, %v1103_v39 }
 0xc5f   : > { %1573 = vmatmul.mubr.msk.bf16.vlgmr.msra.gmra.mrb[16].mxu0 %vm530_vm3, %v1104_v41 }
 0xc60   : > { %1592 = vmatprep.mubr.msk.bf16.mxu0 %vm1756_vm0, %v1755_v1  ;;  %1589 = vmatpush3.bf16.msra.mxu0 %v1652_v51 }
 0xc61   : > { %1590 = vmatprep.subr.bf16.mxu0 %v1755_v1  ;;  %v1458_v1 = vld [vmem:[%s2114_s11] ss:$0 sm:$0xff] }
 0xc64   : > { %1591 = vmatpush3.bf16.msra.mxu0 %v1653_v52 }
 0xd32   : > { %v1165_v44 = vpop.f32.mrb[16].mxu0 }
 0xd33   : > { %v1166_v45 = vadd.f32 %v1448_v43, %v1165_v44  ;;  %v1574_v46 = vpop.f32.mrb[17].mxu0 }
 0xd34   : > { %v1168_v47 = vpop.f32.mrb[18].mxu0 }
 0xd35   : > { %v1171_v48 = vmax.f32 %v1166_v45, 0.0  ;;  %v1575_v49 = vpop.f32.mrb[19].mxu0 }
 0xd37   : > { %v1172_v50 = vpack.c.bf16 %v1171_v48, %v1171_v48 }
 0xd39   : > { %1585 = vmatmul.mubr.msk.bf16.vlgmr.msra.gmra.mrb[20].mxu1 %vm482_vm2, %v1172_v50 }
 0xe0c   : > { %v1249_v54 = vpop.f32.mrb[20].mxu1 }
 0xe0d   : > { %v1250_v55 = vadd.f32 %v1452_v53, %v1249_v54  ;;  %v1586_v56 = vpop.f32.mrb[21].mxu1 }
 0xe0e   : > { %v1252_v57 = vpop.f32.mrb[22].mxu1 }
 0xe0f   : > { %v1255_v59 = vmax.f32 %v1250_v55, 0.0  ;;  %v1587_v60 = vpop.f32.mrb[23].mxu1 }
 0xe11   : > { %v1256_v61 = vpack.c.bf16 %v1255_v59, %v1255_v59 }
 0xe13   : > { %1593 = vmatmul.mubr.msk.bf16.vlgmr.msra.gmra.mrb[20].mxu0 %vm530_vm3, %v1256_v61 }
 0xee6   : > { %v1317_v62 = vpop.f32.mrb[20].mxu0 }
 0xee7   : > { %v1318_v63 = vadd.f32 %v1458_v1, %v1317_v62  ;;  %v1594_v0 = vpop.f32.mrb[21].mxu0 }
 0xee8   : > { %v1320_v2 = vpop.f32.mrb[22].mxu0 }
 0xee9   : > { %1323 = vst [vmem:[%s438_s15] sm:$0xff] %v1318_v63  ;;  %v1595_v3 = vpop.f32.mrb[23].mxu0 }
 0xeea PF: > { %s24_s21 = sadd.s32 1, %s1748_s21  }
 0xeeb   : > { %p21_p5 = scmp.ge.s32.totalorder %s24_s21, 4  }
 0xeed   :  { %23 = sbr.rel (!%p21_p5) target bundleno = 2 (0x2), region = 111 }
 0xef4   :  { %1343 = vsyncpa [#allocation3], 1 }
 0xef5   :  { %1345 = vsyncpa [#allocation3 + $0x1], 1 }
 0xef6   :  { %1346 = vsyncpa [#allocation5], 1 }

</bundles_post_ra>
